<compile_context>
chip_gen: v5e
topology: v5e:2x2
jax: 0.10.0
libtpu: 0.0.40
codegen_flags: <defaults>
</compile_context>

<pallas_src>
import jax
import jax.numpy as jnp
from jax.experimental import pallas as pl
from jax.experimental.pallas import tpu as pltpu


# ----------------------------------------------------------------------------
# Pallas kernel
# ----------------------------------------------------------------------------

def _time2vec_kernel(x_ref, w_ref, b_ref, o_ref):
    """One (tm, tn) output tile: y = x * w + b; sin everywhere, affine col 0."""
    x = x_ref[...].astype(jnp.float32)          # (tm, 1)
    w = w_ref[...].astype(jnp.float32)          # (1, tn)
    b = b_ref[...].astype(jnp.float32)          # (1, tn)
    y = x * w + b                               # (tm, tn), broadcast in VMEM
    o_ref[...] = jnp.sin(y).astype(o_ref.dtype)

    # Identity channel exists only in global column 0, i.e. channel tile j==0.
    # Overwrite just that column there; every other tile does zero extra work.
    @pl.when(pl.program_id(1) == 0)
    def _():
        o_ref[:, :1] = y[:, :1].astype(o_ref.dtype)


# ----------------------------------------------------------------------------
# Wrapper: tiling + pallas_call (no output padding, no post-kernel slice)
# ----------------------------------------------------------------------------

def _round_up(n, m):
    return ((n + m - 1) // m) * m


def time2vec(x, w0, b0, wn, bn, *, out_dtype=None):
    """Time2Vec forward.  x: arbitrary shape -> output x.shape + (embed_dim,)."""
    orig_shape = x.shape
    if out_dtype is None:
        out_dtype = jnp.result_type(x.dtype, jnp.asarray(wn).dtype)

    # Pack [w0, wn...] / [b0, bn...] into single (1, D) rows (fused "concat").
    w_full = jnp.concatenate([jnp.reshape(w0, (1,)), jnp.reshape(wn, (-1,))])
    b_full = jnp.concatenate([jnp.reshape(b0, (1,)), jnp.reshape(bn, (-1,))])
    D = w_full.shape[0]

    xf = x.reshape(-1, 1)
    M = xf.shape[0]

    # Row tile: large (amortizes ~0.35us/step, big DMAs), sublane-aligned for
    # the output dtype.  pl.cdiv grid => Pallas masks the ragged last block.
    itemsize = jnp.dtype(out_dtype).itemsize
    sub = 8 if itemsize >= 4 else (16 if itemsize == 2 else 32)
    tm = min(1024, _round_up(M, sub))

    # Channel tile: lane-dense multiple of 128 when D allows; otherwise one
    # full-D block (block dim == full array dim is always legal).
    if D % 128 == 0:
        tn = next(c for c in (512, 256, 128) if D % c == 0)
    else:
        tn = D

    grid = (pl.cdiv(M, tm), pl.cdiv(D, tn))

    out = pl.pallas_call(
        _time2vec_kernel,
        out_shape=jax.ShapeDtypeStruct((M, D), out_dtype),
        grid=grid,
        in_specs=[
            pl.BlockSpec((tm, 1), lambda i, j: (i, 0)),     # x column block
            pl.BlockSpec((1, tn), lambda i, j: (0, j)),     # packed weights
            pl.BlockSpec((1, tn), lambda i, j: (0, j)),     # packed biases
        ],
        out_specs=pl.BlockSpec((tm, tn), lambda i, j: (i, j)),
        compiler_params=pltpu.CompilerParams(
            dimension_semantics=("parallel", "parallel")),
    )(xf, w_full.reshape(1, D), b_full.reshape(1, D))

    return out.reshape(*orig_shape, D)


# ----------------------------------------------------------------------------
# Pure-JAX reference (matches the PyTorch module)
# ----------------------------------------------------------------------------

def time2vec_ref(x, w0, b0, wn, bn):
    xe = x[..., None].astype(jnp.float32)                    # (..., 1)
    affine_0 = xe * jnp.reshape(w0, (1,)).astype(jnp.float32) \
        + jnp.reshape(b0, (1,)).astype(jnp.float32)          # (..., 1)
    remain = jnp.sin(xe * jnp.reshape(wn, (-1,)).astype(jnp.float32)
                     + jnp.reshape(bn, (-1,)).astype(jnp.float32))
    return jnp.concatenate([affine_0, remain], axis=-1)


# ----------------------------------------------------------------------------

if __name__ == "__main__":
    key = jax.random.PRNGKey(0)
    kx, kw0, kb0, kwn, kbn = jax.random.split(key, 5)

    # ---- Test 1: lane-dense embed dim (128), f32 ----------------------------
    B, S, EMBED = 2, 8, 128
    x = 10.0 * jax.random.normal(kx, (B, S), dtype=jnp.float32)
    w0 = jax.random.normal(kw0, (), dtype=jnp.float32)
    b0 = jax.random.normal(kb0, (), dtype=jnp.float32)
    wn = jax.random.normal(kwn, (EMBED - 1,), dtype=jnp.float32)
    bn = jax.random.normal(kbn, (EMBED - 1,), dtype=jnp.float32)

    out = jax.block_until_ready(time2vec(x, w0, b0, wn, bn))
    ref = time2vec_ref(x, w0, b0, wn, bn)
    assert out.shape == (B, S, EMBED)
    assert bool(jnp.all(jnp.isfinite(out)))
    assert bool(jnp.allclose(out, ref, atol=1e-5, rtol=1e-5))

    # ---- Test 2: ragged rows + non-multiple-of-128 embed dim, f32 -----------
    B2, S2, EMBED2 = 3, 7, 96
    x2 = 10.0 * jax.random.normal(kx, (B2, S2), dtype=jnp.float32)
    wn2 = jax.random.normal(kwn, (EMBED2 - 1,), dtype=jnp.float32)
    bn2 = jax.random.normal(kbn, (EMBED2 - 1,), dtype=jnp.float32)

    out2 = jax.block_until_ready(time2vec(x2, w0, b0, wn2, bn2))
    ref2 = time2vec_ref(x2, w0, b0, wn2, bn2)
    assert out2.shape == (B2, S2, EMBED2)
    assert bool(jnp.all(jnp.isfinite(out2)))
    assert bool(jnp.allclose(out2, ref2, atol=1e-5, rtol=1e-5))

    # ---- Test 3: bf16 model dtype (f32 math inside, cast at the store) ------
    xb = x.astype(jnp.bfloat16)
    wnb, bnb = wn.astype(jnp.bfloat16), bn.astype(jnp.bfloat16)
    w0b, b0b = w0.astype(jnp.bfloat16), b0.astype(jnp.bfloat16)
    out3 = jax.block_until_ready(time2vec(xb, w0b, b0b, wnb, bnb))
    ref3 = time2vec_ref(xb, w0b, b0b, wnb, bnb)
    assert out3.dtype == jnp.bfloat16 and out3.shape == (B, S, EMBED)
    assert bool(jnp.allclose(out3.astype(jnp.float32), ref3, atol=5e-2, rtol=5e-2))

    print("KERNEL_OK")
</pallas_src>

<mosaic_0001>
module attributes {stable_mosaic.version = 11 : i64} {
  func.func @_time2vec_kernel(%arg0: i32, %arg1: i32, %arg2: memref<16x1xf32, #tpu.memory_space<vmem>>, %arg3: memref<1x128xf32, #tpu.memory_space<vmem>>, %arg4: memref<1x128xf32, #tpu.memory_space<vmem>>, %arg5: memref<16x128xf32, #tpu.memory_space<vmem>>) attributes {dimension_semantics = [#tpu.dimension_semantics<parallel>, #tpu.dimension_semantics<parallel>], iteration_bounds = array<i64: 1, 1>, scalar_prefetch = 0 : i64, scratch_operands = 0 : i64, tpu.core_type = #tpu.core_type<tc>, window_params = [{transform_indices = @transform_0, window_bounds = array<i64: 16, 1>}, {transform_indices = @transform_1, window_bounds = array<i64: 1, 128>}, {transform_indices = @transform_2, window_bounds = array<i64: 1, 128>}, {transform_indices = @transform_3, window_bounds = array<i64: 16, 128>}]} {
    %c0 = arith.constant 0 : index
    %c0_0 = arith.constant 0 : index
    %0 = vector.load %arg2[%c0, %c0_0] : memref<16x1xf32, #tpu.memory_space<vmem>>, vector<16x1xf32>
    %c0_1 = arith.constant 0 : index
    %c0_2 = arith.constant 0 : index
    %1 = vector.load %arg3[%c0_1, %c0_2] : memref<1x128xf32, #tpu.memory_space<vmem>>, vector<1x128xf32>
    %c0_3 = arith.constant 0 : index
    %c0_4 = arith.constant 0 : index
    %2 = vector.load %arg4[%c0_3, %c0_4] : memref<1x128xf32, #tpu.memory_space<vmem>>, vector<1x128xf32>
    %3 = vector.broadcast %0 : vector<16x1xf32> to vector<16x128xf32>
    %4 = vector.broadcast %1 : vector<1x128xf32> to vector<16x128xf32>
    %5 = arith.mulf %3, %4 : vector<16x128xf32>
    %6 = vector.broadcast %2 : vector<1x128xf32> to vector<16x128xf32>
    %7 = arith.addf %5, %6 : vector<16x128xf32>
    %8 = math.sin %7 : vector<16x128xf32>
    %c0_5 = arith.constant 0 : index
    %c0_6 = arith.constant 0 : index
    %9 = vector.load %arg5[%c0_5, %c0_6] : memref<16x128xf32, #tpu.memory_space<vmem>>, vector<16x128xf32>
    tpu.vector_store %arg5[%c0_5, %c0_6], %8 {strides = array<i32>} : memref<16x128xf32, #tpu.memory_space<vmem>>, vector<16x128xf32>,
    %c0_i32 = arith.constant 0 : i32
    %10 = arith.cmpi eq, %arg1, %c0_i32 : i32
    %11 = arith.extui %10 : i1 to i32
    %c0_i32_7 = arith.constant 0 : i32
    %12 = arith.cmpi ne, %11, %c0_i32_7 : i32
    scf.if %12 {
      %13 = vector.extract_strided_slice %7 {offsets = [0, 0], sizes = [16, 1], strides = [1, 1]} : vector<16x128xf32> to vector<16x1xf32>
      %c0_8 = arith.constant 0 : index
      %c0_9 = arith.constant 0 : index
      %14 = vector.load %arg5[%c0_8, %c0_9] : memref<16x128xf32, #tpu.memory_space<vmem>>, vector<16x1xf32>
      tpu.vector_store %arg5[%c0_8, %c0_9], %13 {strides = array<i32>} : memref<16x128xf32, #tpu.memory_space<vmem>>, vector<16x1xf32>,
    } else {
    }
    return
  }
  func.func @transform_0(%arg0: i32, %arg1: i32) -> (i32, i32) {
    %c0_i32 = arith.constant 0 : i32
    %c0_i32_0 = arith.constant 0 : i32
    return %arg0, %c0_i32 : i32, i32
  }
  func.func @transform_1(%arg0: i32, %arg1: i32) -> (i32, i32) {
    %c0_i32 = arith.constant 0 : i32
    %c0_i32_0 = arith.constant 0 : i32
    return %c0_i32, %arg1 : i32, i32
  }
  func.func @transform_2(%arg0: i32, %arg1: i32) -> (i32, i32) {
    %c0_i32 = arith.constant 0 : i32
    %c0_i32_0 = arith.constant 0 : i32
    return %c0_i32, %arg1 : i32, i32
  }
  func.func @transform_3(%arg0: i32, %arg1: i32) -> (i32, i32) {
    %c0_i32 = arith.constant 0 : i32
    return %arg0, %arg1 : i32, i32
  }
}

</mosaic_0001>

<bundles_post_ra>
// kernel: tpu_custom_call.1
= control target key start
LH: loop header
LB: loop body
LE: loop exit
PB: predicated region body
PF: predicated region fallthrough
CT: control target
= control target key end

     0   :  { %v421_v1 = vmov 0   ;;  %s623_s0 = inlined_call_operand.vmem [shape: f32[16,1], index: 0, kind: input, shape index: {}]   ;;  %s624_s1 = inlined_call_operand.vmem [shape: f32[1,128], index: 1, kind: input, shape index: {}]   ;;  %s625_s2 = inlined_call_operand.vmem [shape: f32[1,128], index: 2, kind: input, shape index: {}]   ;;  %s626_s3 = inlined_call_operand.hbm [shape: f32[16,128], index: 3, kind: output, shape index: {}]  }
   0x1   :  { %v15_v0 = vld [vmem:[%s623_s0] sm:$0xff]  ;;  %392 = vset.pattern.permute.xlu0 %v421_v1 }
   0x2   :  { %21 = vperm.xlu0 %392, %v15_v0  }
   0x3   :  { %8 = vsyncpa [#allocation3], 0  ;;  %v16_v2 = vld [vmem:[%s623_s0 + $0x8] sm:$0xff]  ;;  %v393_v3 = vld [vmem:[%s624_s1] ss:$0 sm:$0xff]  ;;  %s428_s0 = smov [#allocation2]  }
   0x4   :  { %v394_v4 = vld [vmem:[%s625_s2] ss:$0 sm:$0xff]  ;;  %v422_v28 = vmov 683565275   ;;  %v423_v30 = vmov 2475754826  }
   0x5   :  { %v424_v32 = vmov 2131351028   ;;  %v425_v34 = vmov 2102212464   ;;  %v426_v39 = vmov 920167782  }
   0x6   :  { %v427_v42 = vmov 1326507024   ;;  %s362_s1 = sshll.u32 %s428_s0, 4  ;;  %s364_s21 = sshll.u32 %s626_s3, 4  ;;  %s363_s1 = int_to_ptr.vmem [resolvable:$true] %s362_s1  ;;  %s365_s21 = int_to_ptr.hbm [resolvable:$true] %s364_s21 }
   0x7   :  { %s429_s22 = smov 128   ;;  %s430_s23 = smov 8  }
   0xa   :  { %26 = vperm.xlu0 %392, %v16_v2  }
  0x74   :  { %v22_v5 = vpop.permute.xlu0 %21 }
  0x75   :  { %v32_v6 = vmul.f32 %v393_v3, %v22_v5 }
  0x77   :  { %v464_v7 = vadd.f32 %v394_v4, %v32_v6 }
  0x79   :  { %v39_v8 = vand.u32 2147483647, %v464_v7  ;;  %v42_v9 = vand.u32 2139095040, %v464_v7 }
  0x7b   :  { %v43_v10 = vshrl.u32 %v42_v9, 23  ;;  %v46_v11 = vand.u32 8388607, %v39_v8 }
  0x7c   :  { %v27_v12 = vpop.permute.xlu0 %26 }
  0x7d   :  { %v376_v13 = vadd.s32 4294967169, %v43_v10  ;;  %v47_v14 = vor.u32 8388608, %v46_v11  ;;  %v33_v15 = vmul.f32 %v393_v3, %v27_v12 }
  0x7f   :  { %v49_v16 = vadd.s32 1, %v376_v13  ;;  %v470_v17 = vadd.f32 %v394_v4, %v33_v15  ;;  %v472_v18 = vshll.u32 %v47_v14, 8 }
  0x81   :  { %vm50_vm0 = vcmp.gt.s32.totalorder %v49_v16, 0  ;;  %v194_v19 = vand.u32 2147483647, %v470_v17  ;;  %v197_v21 = vand.u32 2139095040, %v470_v17  ;;  %v88_v25 = vand.u32 65535, %v472_v18 }
  0x82   :  { %v51_v20 = vsel %vm50_vm0, %v49_v16, 0  ;;  %v89_v0 = vshrl.u32 %v472_v18, 16 }
  0x83   :  { %v53_v22 = vand.u32 31, %v51_v20  ;;  %v52_v23 = vshrl.u32 %v51_v20, 5  ;;  %v198_v26 = vshrl.u32 %v197_v21, 23  ;;  %v201_v27 = vand.u32 8388607, %v194_v19 }
  0x85   :  { %v54_v24 = vsub.s32 32, %v53_v22  ;;  %v56_v29 = vshll.u32 %v422_v28, %v53_v22  ;;  %v59_v31 = vshll.u32 %v423_v30, %v53_v22  ;;  %v62_v33 = vshll.u32 %v424_v32, %v53_v22 }
  0x86   :  { %v65_v35 = vshll.u32 %v425_v34, %v53_v22  ;;  %v68_v40 = vshll.u32 %v426_v39, %v53_v22  ;;  %vm71_vm1 = vcmp.lt.s32.totalorder %v52_v23, 1  ;;  %vm72_vm2 = vcmp.lt.s32.totalorder %v52_v23, 2 }
  0x87   :  { %v57_v36 = vshrl.u32 %v423_v30, %v54_v24  ;;  %v60_v37 = vshrl.u32 %v424_v32, %v54_v24  ;;  %v63_v38 = vshrl.u32 %v425_v34, %v54_v24  ;;  %v66_v41 = vshrl.u32 %v426_v39, %v54_v24 }
  0x88   :  { %v69_v43 = vshrl.u32 %v427_v42, %v54_v24  ;;  %v379_v47 = vadd.s32 4294967169, %v198_v26  ;;  %v55_v48 = vshrl.u32 %v422_v28, %v54_v24  ;;  %vm74_vm3 = vcmp.lt.s32.totalorder %v52_v23, 4 }
  0x89   :  { %v58_v44 = vor.u32 %v57_v36, %v56_v29  ;;  %v61_v45 = vor.u32 %v60_v37, %v59_v31  ;;  %v64_v46 = vor.u32 %v63_v38, %v62_v33  ;;  %v67_v49 = vor.u32 %v66_v41, %v65_v35 }
  0x8a   :  { %v70_v50 = vor.u32 %v69_v43, %v68_v40  ;;  %vm73_vm4 = vcmp.lt.s32.totalorder %v52_v23, 3  ;;  %v202_v56 = vor.u32 8388608, %v201_v27  ;;  %v204_v57 = vadd.s32 1, %v379_v47 }
  0x8b   :  { %v76_v51 = vsel %vm74_vm3, %v64_v46, 2102212464  ;;  %v79_v52 = vsel %vm71_vm1, %v58_v44, %v61_v45  ;;  %v83_v53 = vsel %vm71_vm1, %v61_v45, %v64_v46  ;;  %v80_v54 = vsel %vm74_vm3, %v67_v49, 920167782 }
  0x8c   :  { %v84_v55 = vsel %vm74_vm3, %v70_v50, 1326507024  ;;  %v75_v58 = vsel %vm71_vm1, %v55_v48, %v58_v44  ;;  %v77_v59 = vsel %vm73_vm4, %v61_v45, %v76_v51  ;;  %v81_v60 = vsel %vm73_vm4, %v64_v46, %v80_v54 }
  0x8d   :  { %v85_v61 = vsel %vm73_vm4, %v67_v49, %v84_v55  ;;  %v82_v62 = vsel %vm72_vm2, %v79_v52, %v81_v60  ;;  %vm205_vm5 = vcmp.gt.s32.totalorder %v204_v57, 0  ;;  %v497_v6 = vsel %vm72_vm2, %v75_v58, %v77_v59 }
  0x8e   :  { %v86_v63 = vsel %vm72_vm2, %v83_v53, %v85_v61  ;;  %v112_v4 = vand.u32 65535, %v82_v62  ;;  %v113_v5 = vshrl.u32 %v82_v62, 16  ;;  %v206_v11 = vsel %vm205_vm5, %v204_v57, 0 }
  0x8f   :  { %v90_v2 = vand.u32 65535, %v86_v63  ;;  %v91_v3 = vshrl.u32 %v86_v63, 16  ;;  %v499_v12 = vshll.u32 %v202_v56, 8  ;;  %v208_v35 = vand.u32 31, %v206_v11 }
  0x90   :  { %v115_v15 = vmul.u32 %v113_v5, %v88_v25  ;;  %v116_v16 = vmul.u32 %v112_v4, %v89_v0  ;;  %v114_v22 = vmul.u32 %v112_v4, %v88_v25  ;;  %v117_v24 = vmul.u32 %v113_v5, %v89_v0 }
  0x91   :  { %v93_v9 = vmul.u32 %v91_v3, %v88_v25  ;;  %v94_v10 = vmul.u32 %v90_v2, %v89_v0  ;;  %v92_v13 = vmul.u32 %v90_v2, %v88_v25  ;;  %v95_v14 = vmul.u32 %v91_v3, %v89_v0 }
  0x92   :  { %v118_v29 = vshll.u32 %v115_v15, 16  ;;  %v119_v31 = vshrl.u32 %v115_v15, 16  ;;  %v120_v33 = vshll.u32 %v116_v16, 16  ;;  %v121_v37 = vshrl.u32 %v116_v16, 16 }
  0x93   :  { %v96_v20 = vshll.u32 %v93_v9, 16  ;;  %v97_v21 = vshrl.u32 %v93_v9, 16  ;;  %v98_v26 = vshll.u32 %v94_v10, 16  ;;  %v99_v27 = vshrl.u32 %v94_v10, 16 }
  0x94   :  { %vm122_vm7 = vc.u32 %v114_v22, %v118_v29  ;;  %v124_v38 = vadd.s32 %v118_v29, %v114_v22  ;;  %v503_v43 = vsub.s32 32, %v208_v35  ;;  %v506_v45 = vshrl.u32 %v206_v11, 5 }
  0x95   :  { %vm100_vm6 = vc.u32 %v92_v13, %v96_v20  ;;  %v102_v23 = vadd.s32 %v96_v20, %v92_v13  ;;  %v123_v41 = vsel %vm122_vm7, 1, %v421_v1  ;;  %v211_v49 = vshll.u32 %v422_v28, %v208_v35 }
  0x96   :  { %v101_v36 = vsel %vm100_vm6, 1, %v421_v1  ;;  %v125_v44 = vadd.s32 %v123_v41, %v117_v24  ;;  %vm126_vm9 = vc.u32 %v124_v38, %v120_v33  ;;  %v509_v48 = vadd.s32 %v124_v38, %v120_v33 }
  0x97   :  { %v103_v40 = vadd.s32 %v101_v36, %v95_v14  ;;  %vm104_vm8 = vc.u32 %v102_v23, %v98_v26  ;;  %v127_v47 = vsel %vm126_vm9, 1, %v421_v1  ;;  %v212_v51 = vshrl.u32 %v423_v30, %v503_v43 }
  0x98   :  { %v105_v25 = vsel %vm104_vm8, 1, %v421_v1  ;;  %v129_v50 = vadd.s32 %v127_v47, %v125_v44  ;;  %v214_v52 = vshll.u32 %v423_v30, %v208_v35  ;;  %v215_v53 = vshrl.u32 %v424_v32, %v503_v43 }
  0x99   :  { %v107_v46 = vadd.s32 %v105_v25, %v103_v40  ;;  %v217_v55 = vshll.u32 %v424_v32, %v208_v35  ;;  %v218_v56 = vshrl.u32 %v425_v34, %v503_v43  ;;  %v220_v57 = vshll.u32 %v425_v34, %v208_v35 }
  0x9a   :  { %v130_v58 = vadd.s32 %v129_v50, %v119_v31  ;;  %v521_v59 = vor.u32 %v212_v51, %v211_v49  ;;  %v523_v60 = vor.u32 %v215_v53, %v214_v52  ;;  %v221_v61 = vshrl.u32 %v426_v39, %v503_v43 }
  0x9b   :  { %v108_v54 = vadd.s32 %v107_v46, %v97_v21  ;;  %v219_v62 = vor.u32 %v218_v56, %v217_v55  ;;  %v223_v63 = vshll.u32 %v426_v39, %v208_v35  ;;  %v224_v32 = vshrl.u32 %v427_v42, %v503_v43 }
  0x9c   :  { %v131_v0 = vadd.s32 %v130_v58, %v121_v37  ;;  %v222_v2 = vor.u32 %v221_v61, %v220_v57  ;;  %v132_v34 = vmul.u32 %v472_v18, %v497_v6  ;;  %vm226_vm11 = vcmp.lt.s32.totalorder %v506_v45, 1 }
  0x9d   :  { %v527_v30 = vadd.s32 %v108_v54, %v99_v27  ;;  %v225_v3 = vor.u32 %v224_v32, %v223_v63  ;;  %vm229_vm12 = vcmp.lt.s32.totalorder %v506_v45, 4  ;;  %v234_v39 = vsel %vm226_vm11, %v521_v59, %v523_v60 }
  0x9e   :  { %v135_v4 = vadd.s32 1, %v131_v0  ;;  %v243_v42 = vand.u32 65535, %v499_v12  ;;  %vm228_vm13 = vcmp.lt.s32.totalorder %v506_v45, 3  ;;  %v235_v18 = vsel %vm229_vm12, %v222_v2, 920167782 }
  0x9f   :  { %vm134_vm10 = vc.u32 %v527_v30, %v509_v48  ;;  %v238_v5 = vsel %vm226_vm11, %v523_v60, %v219_v62  ;;  %v239_v6 = vsel %vm229_vm12, %v225_v3, 1326507024  ;;  %vm227_vm14 = vcmp.lt.s32.totalorder %v506_v45, 2 }
  0xa0   :  { %v136_v9 = vsel %vm134_vm10, %v135_v4, %v131_v0  ;;  %v236_v10 = vsel %vm228_vm13, %v219_v62, %v235_v18  ;;  %v240_v11 = vsel %vm228_vm13, %v222_v2, %v239_v6  ;;  %v244_v16 = vshrl.u32 %v499_v12, 16 }
  0xa1   :  { %v137_v13 = vadd.s32 %v136_v9, %v132_v34  ;;  %v237_v14 = vsel %vm227_vm14, %v234_v39, %v236_v10  ;;  %v241_v15 = vsel %vm227_vm14, %v238_v5, %v240_v11  ;;  %v231_v38 = vsel %vm229_vm12, %v219_v62, 2102212464 }
  0xa2   :  { %v245_v20 = vand.u32 65535, %v241_v15  ;;  %v246_v21 = vshrl.u32 %v241_v15, 16  ;;  %v267_v22 = vand.u32 65535, %v237_v14  ;;  %v268_v24 = vshrl.u32 %v237_v14, 16 }
  0xa3   :  { %v138_v26 = vadd.s32 536870912, %v137_v13  ;;  %v210_v63 = vshrl.u32 %v422_v28, %v503_v43  ;;  %v133_v11 = vadd.s32 %v509_v48, %v527_v30  ;;  %vm41_vm6 = vcmp.lt.s32.totalorder %v464_v7, 0 }
  0xa4   :  { %v248_v27 = vmul.u32 %v246_v21, %v243_v42  ;;  %v249_v29 = vmul.u32 %v245_v20, %v244_v16  ;;  %v270_v23 = vmul.u32 %v268_v24, %v243_v42  ;;  %v271_v33 = vmul.u32 %v267_v22, %v244_v16 }
  0xa5   :  { %v561_v31 = vshrl.u32 %v138_v26, 30  ;;  %v247_v35 = vmul.u32 %v245_v20, %v243_v42  ;;  %v250_v40 = vmul.u32 %v246_v21, %v244_v16  ;;  %v269_v46 = vmul.u32 %v267_v22, %v243_v42 }
  0xa6   :  { %v251_v36 = vshll.u32 %v248_v27, 16  ;;  %v273_v41 = vshll.u32 %v270_v23, 16  ;;  %v253_v25 = vshll.u32 %v249_v29, 16  ;;  %v272_v50 = vmul.u32 %v268_v24, %v244_v16 }
  0xa7   :  { %v140_v37 = vshll.u32 %v561_v31, 30  ;;  %v275_v51 = vshll.u32 %v271_v33, 16  ;;  %v252_v57 = vshrl.u32 %v248_v27, 16  ;;  %v254_v32 = vshrl.u32 %v249_v29, 16 }
  0xa8   :  { %vm255_vm15 = vc.u32 %v247_v35, %v251_v36  ;;  %v257_v44 = vadd.s32 %v251_v36, %v247_v35  ;;  %vm277_vm1 = vc.u32 %v269_v46, %v273_v41  ;;  %v279_v53 = vadd.s32 %v273_v41, %v269_v46 }
  0xa9   :  { %v141_v47 = vsub.s32 %v137_v13, %v140_v37  ;;  %v256_v49 = vsel %vm255_vm15, 1, %v421_v1  ;;  %v278_v56 = vsel %vm277_vm1, 1, %v421_v1  ;;  %v274_v3 = vshrl.u32 %v270_v23, 16 }
  0xaa   :  { %v258_v52 = vadd.s32 %v256_v49, %v250_v40  ;;  %vm259_vm0 = vc.u32 %v257_v44, %v253_v25  ;;  %v280_v61 = vadd.s32 %v278_v56, %v272_v50  ;;  %vm281_vm3 = vc.u32 %v279_v53, %v275_v51 }
  0xab   :  { %vm142_vm2 = vcmp.lt.s32.totalorder %v141_v47, 0  ;;  %v143_v54 = vsub.s32 0, %v141_v47  ;;  %v260_v55 = vsel %vm259_vm0, 1, %v421_v1  ;;  %v282_v0 = vsel %vm281_vm3, 1, %v421_v1 }
  0xac   :  { %v262_v58 = vadd.s32 %v260_v55, %v258_v52  ;;  %v284_v4 = vadd.s32 %v282_v0, %v280_v61  ;;  %v230_v39 = vsel %vm226_vm11, %v210_v63, %v521_v59  ;;  %v232_v42 = vsel %vm228_vm13, %v523_v60, %v231_v38 }
  0xad   :  { %v144_v62 = vsel %vm142_vm2, %v143_v54, %v141_v47  ;;  %v276_v6 = vshrl.u32 %v271_v33, 16  ;;  %v283_v28 = vadd.s32 %v279_v53, %v275_v51  ;;  %v233_v1 = vsel %vm227_vm14, %v230_v39, %v232_v42 }
  0xae   :  { %v145_v2 = vclz %v144_v62  ;;  %v263_v34 = vadd.s32 %v262_v58, %v252_v57  ;;  %v285_v9 = vadd.s32 %v284_v4, %v274_v3  ;;  %v287_v60 = vmul.u32 %v499_v12, %v233_v1 }
  0xaf   :  { %vm589_vm8 = vcmp.le.f32.partialorder %v39_v8, 0.7853982  ;;  %v163_v40 = vsub.s32 4, %v561_v31  ;;  %vm196_vm13 = vcmp.lt.s32.totalorder %v470_v17, 0  ;;  %vm182_vm14 = vweird.f32 %v464_v7 }
  0xb0   :  { %v377_v18 = vadd.s32 4294967294, %v145_v2  ;;  %v264_v5 = vadd.s32 %v263_v34, %v254_v32  ;;  %v286_v43 = vadd.s32 %v285_v9, %v276_v6  ;;  %vm355_vm15 = vcmask 7168  }
  0xb1   :  { %vm604_vm0 = vcmp.le.f32.partialorder %v194_v19, 0.7853982 }
  0xb2   :  { %vm378_vm4 = vcmp.lt.s32.totalorder %v377_v18, 0  ;;  %vm289_vm5 = vc.u32 %v264_v5, %v283_v28  ;;  %v290_v14 = vadd.s32 1, %v286_v43  ;;  %v288_v56 = vadd.s32 %v283_v28, %v264_v5 }
  0xb3   :  { %v148_v10 = vsel %vm378_vm4, 0, %v377_v18  ;;  %vm337_vm4 = vweird.f32 %v470_v17 }
  0xb4   :  { %v149_v59 = vsub.s32 32, %v148_v10  ;;  %v153_v13 = vsub.s32 4294967266, %v148_v10  ;;  %v150_v15 = vshll.u32 %v141_v47, %v148_v10  ;;  %v291_v21 = vsel %vm289_vm5, %v290_v14, %v286_v43 }
  0xb5   :  { %v292_v22 = vadd.s32 %v291_v21, %v287_v60  ;;  %v164_v47 = vsel %vm41_vm6, %v163_v40, %v561_v31 }
  0xb6   :  { %v151_v16 = vshrl.u32 %v133_v11, %v149_v59  ;;  %v154_v20 = vadd.s32 127, %v153_v13  ;;  %v166_v54 = vsel %vm589_vm8, 0, %v164_v47 }
  0xb7   :  { %v293_v45 = vadd.s32 536870912, %v292_v22  ;;  %v183_v2 = vadd.s32 3, %v166_v54 }
  0xb8   :  { %v152_v24 = vor.u32 %v151_v16, %v150_v15  ;;  %v155_v26 = vshll.u32 %v154_v20, 23 }
  0xb9   :  { %v583_v29 = vshrl.u32 %v293_v45, 30  ;;  %v184_v9 = vand.u32 3, %v183_v2 }
  0xba   :  { %v156_v27 = vor.u32 4788187, %v155_v26  ;;  %v159_v33 = vcvt.s32.f32 %v152_v24 }
  0xbb   :  { %v295_v48 = vshll.u32 %v583_v29, 30  ;;  %vm186_vm10 = vcmp.eq.s32.totalorder %v184_v9, 0  ;;  %vm189_vm11 = vcmp.eq.s32.totalorder %v184_v9, 2  ;;  %vm185_vm12 = vcmp.lt.s32.totalorder %v184_v9, 2 }
  0xbc   :  { %v157_v23 = vand.u32 2147483647, %v156_v27  ;;  %v318_v21 = vsub.s32 4, %v583_v29 }
  0xbd   :  { %v296_v35 = vsub.s32 %v292_v22, %v295_v48 }
  0xbe   :  { %v160_v30 = vmul.f32 %v159_v33, %v157_v23  ;;  %v319_v19 = vsel %vm196_vm13, %v318_v21, %v583_v29 }
  0xbf   :  { %vm297_vm7 = vcmp.lt.s32.totalorder %v296_v35, 0  ;;  %v298_v12 = vsub.s32 0, %v296_v35  ;;  %v321_v48 = vsel %vm604_vm0, 0, %v319_v19 }
  0xc0   :  { %v161_v36 = vxor.u32 2147483648, %v160_v30 }
  0xc1   :  { %v299_v25 = vsel %vm297_vm7, %v298_v12, %v296_v35  ;;  %v338_v12 = vadd.s32 3, %v321_v48 }
  0xc2   :  { %v162_v38 = vsel %vm41_vm6, %v161_v36, %v160_v30  ;;  %v300_v46 = vclz %v299_v25 }
  0xc3   :  { %v165_v41 = vsel %vm589_vm8, %v464_v7, %v162_v38  ;;  %v339_v25 = vand.u32 3, %v338_v12 }
  0xc4   :  { %v167_v44 = vmul.f32 %v165_v41, %v165_v41  ;;  %v380_v50 = vadd.s32 4294967294, %v300_v46 }
  0xc5   :  { %vm341_vm1 = vcmp.eq.s32.totalorder %v339_v25, 0  ;;  %vm344_vm2 = vcmp.eq.s32.totalorder %v339_v25, 2  ;;  %vm340_vm3 = vcmp.lt.s32.totalorder %v339_v25, 2 }
  0xc6   :  { %v175_v49 = vmul.f32 -0.00019511016, %v167_v44  ;;  %v168_v51 = vmul.f32 -0.001358992, %v167_v44  ;;  %vm381_vm9 = vcmp.lt.s32.totalorder %v380_v50, 0 }
  0xc7   :  { %v303_v53 = vsel %vm381_vm9, 0, %v380_v50 }
  0xc8   :  { %v176_v52 = vadd.f32 0.008332121, %v175_v49  ;;  %v169_v8 = vadd.f32 0.041655596, %v168_v51  ;;  %v304_v57 = vsub.s32 32, %v303_v53  ;;  %v308_v58 = vsub.s32 4294967266, %v303_v53 }
  0xc9   :  { %v305_v63 = vshll.u32 %v296_v35, %v303_v53 }
  0xca   :  { %v177_v55 = vmul.f32 %v176_v52, %v167_v44  ;;  %v170_v61 = vmul.f32 %v169_v8, %v167_v44  ;;  %v306_v32 = vshrl.u32 %v288_v56, %v304_v57  ;;  %v309_v0 = vadd.s32 127, %v308_v58 }
  0xcc   :  { %v178_v62 = vadd.f32 -0.16666654, %v177_v55  ;;  %v171_v31 = vadd.f32 -0.4999988, %v170_v61  ;;  %v307_v3 = vor.u32 %v306_v32, %v305_v63  ;;  %v310_v4 = vshll.u32 %v309_v0, 23 }
  0xce   :  { %v179_v34 = vmul.f32 %v178_v62, %v167_v44  ;;  %v172_v39 = vmul.f32 %v171_v31, %v167_v44  ;;  %v311_v18 = vor.u32 4788187, %v310_v4  ;;  %v314_v5 = vcvt.s32.f32 %v307_v3 }
  0xd0   :  { %v180_v42 = vadd.f32 1.0, %v179_v34  ;;  %v173_v6 = vadd.f32 1.0, %v172_v39  ;;  %v312_v43 = vand.u32 2147483647, %v311_v18 }
  0xd2   :  { %v181_v1 = vmul.f32 %v180_v42, %v165_v41  ;;  %v190_v28 = vxor.u32 2147483648, %v173_v6  ;;  %v315_v10 = vmul.f32 %v314_v5, %v312_v43 }
  0xd4   :  { %v187_v11 = vxor.u32 2147483648, %v181_v1  ;;  %v316_v59 = vxor.u32 2147483648, %v315_v10  ;;  %v191_v14 = vsel %vm189_vm11, %v190_v28, %v181_v1 }
  0xd6   :  { %v188_v13 = vsel %vm186_vm10, %v173_v6, %v187_v11  ;;  %v317_v16 = vsel %vm196_vm13, %v316_v59, %v315_v10 }
  0xd7   :  { %v192_v60 = vsel %vm185_vm12, %v188_v13, %v191_v14  ;;  %v320_v22 = vsel %vm604_vm0, %v470_v17, %v317_v16 }
  0xd8   :  { %v193_v20 = vsel %vm182_vm14, nan, %v192_v60  ;;  %v322_v24 = vmul.f32 %v320_v22, %v320_v22 }
  0xd9   :  { %349 = vst [vmem:[#allocation2] sm:$0xff] %v193_v20 }
  0xda   :  { %356 = vst.msk [vmem:[#allocation2] sm:$0xff] %vm355_vm15, %v464_v7  ;;  %v330_v26 = vmul.f32 -0.00019511016, %v322_v24  ;;  %v323_v45 = vmul.f32 -0.001358992, %v322_v24 }
  0xdc   :  { %v331_v27 = vadd.f32 0.008332121, %v330_v26  ;;  %v324_v23 = vadd.f32 0.041655596, %v323_v45 }
  0xde   :  { %v332_v33 = vmul.f32 %v331_v27, %v322_v24  ;;  %v325_v30 = vmul.f32 %v324_v23, %v322_v24 }
  0xe0   :  { %v333_v35 = vadd.f32 -0.16666654, %v332_v33  ;;  %v326_v36 = vadd.f32 -0.4999988, %v325_v30 }
  0xe2   :  { %v334_v37 = vmul.f32 %v333_v35, %v322_v24  ;;  %v327_v38 = vmul.f32 %v326_v36, %v322_v24 }
  0xe4   :  { %v335_v40 = vadd.f32 1.0, %v334_v37  ;;  %v328_v41 = vadd.f32 1.0, %v327_v38 }
  0xe6   :  { %v336_v7 = vmul.f32 %v335_v40, %v320_v22  ;;  %v345_v44 = vxor.u32 2147483648, %v328_v41 }
  0xe8   :  { %v342_v46 = vxor.u32 2147483648, %v336_v7  ;;  %v346_v47 = vsel %vm344_vm2, %v345_v44, %v336_v7 }
  0xea   :  { %v343_v29 = vsel %vm341_vm1, %v328_v41, %v342_v46 }
  0xeb   :  { %v347_v49 = vsel %vm340_vm3, %v343_v29, %v346_v47 }
  0xec   :  { %v348_v50 = vsel %vm337_vm4, nan, %v347_v49 }
  0xed   :  { %350 = vst [vmem:[#allocation2 + $0x8] sm:$0xff] %v348_v50 }
  0xee   :  { %357 = vst.msk [vmem:[#allocation2 + $0x8] sm:$0xff] %vm355_vm15, %v470_v17 }
  0xef   :  { %370 = dma.vmem_to_hbm [thread:$0]  %s363_s1, 256, %s365_s21, [#allocation3], %s429_s22, %s429_s22, %s430_s23  }
  0xf0   :  { %419 = dma.done.wait [#allocation3], 256  }
  0xf1   :  { %420 = vsyncadd [#allocation3], 4294967040 }
  0xf2   :  { %375 = vsyncpa [#allocation3], 1 }

</bundles_post_ra>
